<compile_context>
chip_gen: v7x
topology: tpu7x:2x2x1
jax: 0.10.0
libtpu: 0.0.40
codegen_flags: <defaults>
</compile_context>

<pallas_src>
import jax
import jax.numpy as jnp
from jax import lax
from jax.experimental import pallas as pl
from jax.experimental.pallas import tpu as pltpu

TOPIC_LEN = 500          # fixed by the PyTorch mask: torch.ones((B, 1, 500))
_MAX_BT_CAP = 32         # batch rows per grid step, upper cap
_ENC_BUDGET = 24 << 20   # bytes allowed for the double-buffered encoder tiles


def _max_block_b(T, E, budget_bytes=_ENC_BUDGET, cap=_MAX_BT_CAP):
    """Largest sublane-aligned batch tile whose double-buffered encoder slab fits
    the VMEM budget."""
    per_row = 2 * T * E * 4                      # double-buffered f32 bytes per batch row
    bt = max(1, budget_bytes // per_row)
    return int(min(cap, max(8, (bt // 8) * 8)))


def _choose_block_b(batch, max_bt):
    """Pick the batch tile Bt.

    * batch <= max_bt: one full-dim block (always layout-legal); split in two when
      the half is still a multiple of 8 so v7x's two TensorCores both get work.
    * batch  > max_bt: sublane-aligned Bt (multiple of 8), preferring an even grid
      length, then minimal tail padding, then the biggest tile.  grid = cdiv(B,Bt)
      handles the partial last tile (no host-side pad of the encoder)."""
    if batch <= max_bt:
        half = batch // 2
        if batch % 2 == 0 and half % 8 == 0:
            return half
        return batch
    best_key, best_bt = None, 8
    for bt in range(8, max_bt + 1, 8):
        steps = -(-batch // bt)
        pad = steps * bt - batch
        key = (steps % 2 == 0, -pad, bt)
        if best_key is None or key > best_key:
            best_key, best_bt = key, bt
    return best_bt


def _topic_attention_kernel(lens_ref, sub_ref, enc_ref, attn_ref, sum_ref, scores_scr):
    Bt, T = scores_scr.shape

    # --- per-row MXU matmuls: scores[b] = sub[b] @ enc[b]^T (contract shared E axis
    #     directly, no transpose materialized).  Each result goes straight to VMEM
    #     scratch so live ranges stay per-iteration. ------------------------------
    for b in range(Bt):                                        # static unroll
        scores_scr[pl.ds(b, 1), :] = lax.dot_general(
            sub_ref[pl.ds(b, 1), :], enc_ref[b],
            dimension_numbers=(((1,), (1,)), ((), ())),
            preferred_element_type=jnp.float32)                # (1, T)

    # --- whole-tile masked softmax on dense (Bt, T) vregs -----------------------
    scores = scores_scr[...]                                   # (Bt, T) f32
    col = lax.broadcasted_iota(jnp.int32, scores.shape, 1)     # built once per tile
    scores = jnp.where(col >= lens_ref[...], jnp.float32(-jnp.inf), scores)
    m = jnp.max(scores, axis=-1, keepdims=True)
    e = jnp.exp(scores - m)
    denom = jnp.sum(e, axis=-1, keepdims=True)
    inv = jnp.float32(1.0) / denom                             # exact divide on a (Bt,1) column
    attn_ref[...] = (e * inv).astype(attn_ref.dtype)           # dense (Bt, T) store

    # --- weighted sum: per-row (1, T) @ (T, E) on the MXU -----------------------
    for b in range(Bt):
        sum_ref[pl.ds(b, 1), :] = jnp.dot(
            attn_ref[pl.ds(b, 1), :], enc_ref[b],
            preferred_element_type=jnp.float32).astype(sum_ref.dtype)


def topic_attention(decoder_feature, encoder_feature, skill_net_lengths, W):
    """decoder_feature (B, D) f32, encoder_feature (B, T, E) f32,
    skill_net_lengths (B,) int, W (E, D) f32 (same layout as the nn.Parameter).
    Returns (attn (B, 1, T) f32, sumResult (B, E) f32) like the PyTorch forward."""
    B, D = decoder_feature.shape
    _, T, E = encoder_feature.shape
    assert T == TOPIC_LEN

    # subResult = decoderFeature @ W.T, hoisted to one full-rate XLA matmul.
    sub = lax.dot_general(decoder_feature, W,
                          dimension_numbers=(((1,), (1,)), ((), ())),
                          preferred_element_type=jnp.float32)          # (B, E)
    lens2d = skill_net_lengths.astype(jnp.int32).reshape(B, 1)

    Bt = _choose_block_b(B, _max_block_b(T, E))
    grid = (pl.cdiv(B, Bt),)

    # Explicit scoped-VMEM limit: safe on every generation (>16 MiB v5e default,
    # well under v7x's 64 MiB per-TC physical VMEM).
    enc_block = Bt * T * E * 4
    io_block = Bt * (E + T + E + 1) * 4
    vmem_limit = int(min(48 << 20, max(32 << 20, 2 * (enc_block + io_block) + (16 << 20))))

    grid_spec = pltpu.PrefetchScalarGridSpec(
        num_scalar_prefetch=0,
        grid=grid,
        in_specs=[
            pl.BlockSpec((Bt, 1), lambda g: (g, 0)),          # skill_net_lengths
            pl.BlockSpec((Bt, E), lambda g: (g, 0)),          # subResult
            pl.BlockSpec((Bt, T, E), lambda g: (g, 0, 0)),    # encoderFeature (full T, E)
        ],
        out_specs=[
            pl.BlockSpec((Bt, T), lambda g: (g, 0)),          # attn (dense, no size-1 dim)
            pl.BlockSpec((Bt, E), lambda g: (g, 0)),          # sumResult
        ],
        scratch_shapes=[pltpu.VMEM((Bt, T), jnp.float32)],    # per-tile score buffer
    )

    attn2d, summ = pl.pallas_call(
        _topic_attention_kernel,
        out_shape=(
            jax.ShapeDtypeStruct((B, T), jnp.float32),
            jax.ShapeDtypeStruct((B, E), jnp.float32),
        ),
        grid_spec=grid_spec,
        compiler_params=pltpu.CompilerParams(
            dimension_semantics=("parallel",),
            vmem_limit_bytes=vmem_limit),
    )(lens2d, sub, encoder_feature)

    # Restore the PyTorch (B, 1, T) view outside the kernel.
    return attn2d.reshape(B, 1, T), summ


if __name__ == "__main__":
    B = 2
    D = 128   # decoderHiddenDim  (data.src_encoder_hidden_dim)
    E = 128   # encoderHiddenDim  (data.src_embedding_dim)
    T = TOPIC_LEN

    key = jax.random.PRNGKey(0)
    k1, k2, k3 = jax.random.split(key, 3)
    decoder_feature = jax.random.normal(k1, (B, D), jnp.float32)
    encoder_feature = jax.random.normal(k2, (B, T, E), jnp.float32)

    # Deterministic stand-in for xavier_uniform_ on W (E, D): bound = sqrt(6/(fan_in+fan_out))
    bound = (6.0 / (E + D)) ** 0.5
    W = jax.random.uniform(k3, (E, D), jnp.float32, -bound, bound)

    skill_net_lengths = jnp.array([317, 123], dtype=jnp.int32)

    attn, sum_result = topic_attention(decoder_feature, encoder_feature,
                                       skill_net_lengths, W)
    jax.block_until_ready((attn, sum_result))

    # Plain-JAX reference (same math as the PyTorch forward)
    sub = decoder_feature @ W.T                                   # (B, E)
    scores = jnp.einsum('be,bte->bt', sub, encoder_feature)       # (B, T)
    mask = jnp.arange(T)[None, :] >= skill_net_lengths[:, None]
    scores = jnp.where(mask, -jnp.inf, scores)
    ref_attn = jax.nn.softmax(scores, axis=-1)
    ref_sum = jnp.einsum('bt,bte->be', ref_attn, encoder_feature)

    assert attn.shape == (B, 1, T) and sum_result.shape == (B, E)
    assert jnp.allclose(attn[:, 0, :], ref_attn, atol=1e-4), "attn mismatch"
    assert jnp.allclose(sum_result, ref_sum, atol=1e-3), "sumResult mismatch"

    print("KERNEL_OK")
</pallas_src>

<mosaic_0001>
module attributes {stable_mosaic.version = 11 : i64} {
  func.func @_topic_attention_kernel(%arg0: i32, %arg1: memref<2x1xi32, #tpu.memory_space<vmem>>, %arg2: memref<2x128xf32, #tpu.memory_space<vmem>>, %arg3: memref<2x500x128xf32, #tpu.memory_space<vmem>>, %arg4: memref<2x500xf32, #tpu.memory_space<vmem>>, %arg5: memref<2x128xf32, #tpu.memory_space<vmem>>, %arg6: memref<2x500xf32, #tpu.memory_space<vmem>>) attributes {dimension_semantics = [#tpu.dimension_semantics<parallel>], iteration_bounds = array<i64: 1>, scalar_prefetch = 0 : i64, scratch_operands = 1 : i64, tpu.core_type = #tpu.core_type<tc>, window_params = [{transform_indices = @transform_0, window_bounds = array<i64: 2, 1>}, {transform_indices = @transform_1, window_bounds = array<i64: 2, 128>}, {transform_indices = @transform_2, window_bounds = array<i64: 2, 500, 128>}, {transform_indices = @transform_3, window_bounds = array<i64: 2, 500>}, {transform_indices = @transform_4, window_bounds = array<i64: 2, 128>}]} {
    %c0 = arith.constant 0 : index
    %c0_0 = arith.constant 0 : index
    %0 = vector.load %arg2[%c0, %c0_0] : memref<2x128xf32, #tpu.memory_space<vmem>>, vector<1x128xf32>
    %c0_1 = arith.constant 0 : index
    %c0_2 = arith.constant 0 : index
    %c0_3 = arith.constant 0 : index
    %1 = vector.load %arg3[%c0_1, %c0_2, %c0_3] : memref<2x500x128xf32, #tpu.memory_space<vmem>>, vector<1x500x128xf32>
    %2 = vector.shape_cast %1 : vector<1x500x128xf32> to vector<500x128xf32>
    %cst = arith.constant dense<0.000000e+00> : vector<1x500xf32>
    %3 = tpu.matmul %0, %2, %cst {dimension_numbers = #tpu.dot_dimension_numbers<[1], [1], [0], [0], [0, 0, 1, 0], [], []>} : vector<1x128xf32>, vector<500x128xf32>, vector<1x500xf32> -> vector<1x500xf32>
    %c0_4 = arith.constant 0 : index
    %c0_5 = arith.constant 0 : index
    %4 = vector.load %arg6[%c0_4, %c0_5] : memref<2x500xf32, #tpu.memory_space<vmem>>, vector<1x500xf32>
    tpu.vector_store %arg6[%c0_4, %c0_5], %3 {strides = array<i32>} : memref<2x500xf32, #tpu.memory_space<vmem>>, vector<1x500xf32>,
    %c1 = arith.constant 1 : index
    %c0_6 = arith.constant 0 : index
    %5 = vector.load %arg2[%c1, %c0_6] : memref<2x128xf32, #tpu.memory_space<vmem>>, vector<1x128xf32>
    %c1_7 = arith.constant 1 : index
    %c0_8 = arith.constant 0 : index
    %c0_9 = arith.constant 0 : index
    %6 = vector.load %arg3[%c1_7, %c0_8, %c0_9] : memref<2x500x128xf32, #tpu.memory_space<vmem>>, vector<1x500x128xf32>
    %7 = vector.shape_cast %6 : vector<1x500x128xf32> to vector<500x128xf32>
    %cst_10 = arith.constant dense<0.000000e+00> : vector<1x500xf32>
    %8 = tpu.matmul %5, %7, %cst_10 {dimension_numbers = #tpu.dot_dimension_numbers<[1], [1], [0], [0], [0, 0, 1, 0], [], []>} : vector<1x128xf32>, vector<500x128xf32>, vector<1x500xf32> -> vector<1x500xf32>
    %c1_11 = arith.constant 1 : index
    %c0_12 = arith.constant 0 : index
    %9 = vector.load %arg6[%c1_11, %c0_12] : memref<2x500xf32, #tpu.memory_space<vmem>>, vector<1x500xf32>
    tpu.vector_store %arg6[%c1_11, %c0_12], %8 {strides = array<i32>} : memref<2x500xf32, #tpu.memory_space<vmem>>, vector<1x500xf32>,
    %c0_13 = arith.constant 0 : index
    %c0_14 = arith.constant 0 : index
    %10 = vector.load %arg6[%c0_13, %c0_14] : memref<2x500xf32, #tpu.memory_space<vmem>>, vector<2x500xf32>
    %11 = tpu.iota {dimensions = array<i32: 1>} : vector<2x500xi32>
    %c0_15 = arith.constant 0 : index
    %c0_16 = arith.constant 0 : index
    %12 = vector.load %arg1[%c0_15, %c0_16] : memref<2x1xi32, #tpu.memory_space<vmem>>, vector<2x1xi32>
    %13 = vector.broadcast %12 : vector<2x1xi32> to vector<2x500xi32>
    %14 = arith.cmpi sge, %11, %13 : vector<2x500xi32>
    %cst_17 = arith.constant 0xFF800000 : f32
    %15 = vector.broadcast %cst_17 : f32 to vector<2x500xf32>
    %16 = arith.select %14, %15, %10 : vector<2x500xi1>, vector<2x500xf32>
    %cst_18 = arith.constant dense<0xFF800000> : vector<2xf32>
    %17 = vector.multi_reduction <maximumf>, %16, %cst_18 [1] : vector<2x500xf32> to vector<2xf32>
    %18 = vector.shape_cast %17 : vector<2xf32> to vector<2x1xf32>
    %19 = vector.broadcast %18 : vector<2x1xf32> to vector<2x500xf32>
    %20 = arith.subf %16, %19 : vector<2x500xf32>
    %21 = math.exp %20 : vector<2x500xf32>
    %cst_19 = arith.constant dense<0.000000e+00> : vector<2xf32>
    %22 = vector.multi_reduction <add>, %21, %cst_19 [1] : vector<2x500xf32> to vector<2xf32>
    %23 = vector.shape_cast %22 : vector<2xf32> to vector<2x1xf32>
    %cst_20 = arith.constant 1.000000e+00 : f32
    %24 = vector.broadcast %cst_20 : f32 to vector<2x1xf32>
    %25 = arith.divf %24, %23 : vector<2x1xf32>
    %26 = vector.broadcast %25 : vector<2x1xf32> to vector<2x500xf32>
    %27 = arith.mulf %21, %26 : vector<2x500xf32>
    %c0_21 = arith.constant 0 : index
    %c0_22 = arith.constant 0 : index
    %28 = vector.load %arg4[%c0_21, %c0_22] : memref<2x500xf32, #tpu.memory_space<vmem>>, vector<2x500xf32>
    tpu.vector_store %arg4[%c0_21, %c0_22], %27 {strides = array<i32>} : memref<2x500xf32, #tpu.memory_space<vmem>>, vector<2x500xf32>,
    %c0_23 = arith.constant 0 : index
    %c0_24 = arith.constant 0 : index
    %29 = vector.load %arg4[%c0_23, %c0_24] : memref<2x500xf32, #tpu.memory_space<vmem>>, vector<1x500xf32>
    %c0_25 = arith.constant 0 : index
    %c0_26 = arith.constant 0 : index
    %c0_27 = arith.constant 0 : index
    %30 = vector.load %arg3[%c0_25, %c0_26, %c0_27] : memref<2x500x128xf32, #tpu.memory_space<vmem>>, vector<1x500x128xf32>
    %31 = vector.shape_cast %30 : vector<1x500x128xf32> to vector<500x128xf32>
    %cst_28 = arith.constant dense<0.000000e+00> : vector<1x128xf32>
    %32 = tpu.matmul %29, %31, %cst_28 {dimension_numbers = #tpu.dot_dimension_numbers<[1], [0], [0], [1], [0, 0, 1, 1], [], []>} : vector<1x500xf32>, vector<500x128xf32>, vector<1x128xf32> -> vector<1x128xf32>
    %c0_29 = arith.constant 0 : index
    %c0_30 = arith.constant 0 : index
    %33 = vector.load %arg5[%c0_29, %c0_30] : memref<2x128xf32, #tpu.memory_space<vmem>>, vector<1x128xf32>
    tpu.vector_store %arg5[%c0_29, %c0_30], %32 {strides = array<i32>} : memref<2x128xf32, #tpu.memory_space<vmem>>, vector<1x128xf32>,
    %c1_31 = arith.constant 1 : index
    %c0_32 = arith.constant 0 : index
    %34 = vector.load %arg4[%c1_31, %c0_32] : memref<2x500xf32, #tpu.memory_space<vmem>>, vector<1x500xf32>
    %c1_33 = arith.constant 1 : index
    %c0_34 = arith.constant 0 : index
    %c0_35 = arith.constant 0 : index
    %35 = vector.load %arg3[%c1_33, %c0_34, %c0_35] : memref<2x500x128xf32, #tpu.memory_space<vmem>>, vector<1x500x128xf32>
    %36 = vector.shape_cast %35 : vector<1x500x128xf32> to vector<500x128xf32>
    %cst_36 = arith.constant dense<0.000000e+00> : vector<1x128xf32>
    %37 = tpu.matmul %34, %36, %cst_36 {dimension_numbers = #tpu.dot_dimension_numbers<[1], [0], [0], [1], [0, 0, 1, 1], [], []>} : vector<1x500xf32>, vector<500x128xf32>, vector<1x128xf32> -> vector<1x128xf32>
    %c1_37 = arith.constant 1 : index
    %c0_38 = arith.constant 0 : index
    %38 = vector.load %arg5[%c1_37, %c0_38] : memref<2x128xf32, #tpu.memory_space<vmem>>, vector<1x128xf32>
    tpu.vector_store %arg5[%c1_37, %c0_38], %37 {strides = array<i32>} : memref<2x128xf32, #tpu.memory_space<vmem>>, vector<1x128xf32>,
    return
  }
  func.func @transform_0(%arg0: i32) -> (i32, i32) {
    %c0_i32 = arith.constant 0 : i32
    %c0_i32_0 = arith.constant 0 : i32
    return %arg0, %c0_i32 : i32, i32
  }
  func.func @transform_1(%arg0: i32) -> (i32, i32) {
    %c0_i32 = arith.constant 0 : i32
    %c0_i32_0 = arith.constant 0 : i32
    return %arg0, %c0_i32 : i32, i32
  }
  func.func @transform_2(%arg0: i32) -> (i32, i32, i32) {
    %c0_i32 = arith.constant 0 : i32
    %c0_i32_0 = arith.constant 0 : i32
    %c0_i32_1 = arith.constant 0 : i32
    return %arg0, %c0_i32, %c0_i32_0 : i32, i32, i32
  }
  func.func @transform_3(%arg0: i32) -> (i32, i32) {
    %c0_i32 = arith.constant 0 : i32
    %c0_i32_0 = arith.constant 0 : i32
    return %arg0, %c0_i32 : i32, i32
  }
  func.func @transform_4(%arg0: i32) -> (i32, i32) {
    %c0_i32 = arith.constant 0 : i32
    %c0_i32_0 = arith.constant 0 : i32
    return %arg0, %c0_i32 : i32, i32
  }
}

</mosaic_0001>

<bundles_post_ra>
// kernel: tpu_custom_call.1
= control target key start
LH: loop header
LB: loop body
LE: loop exit
PB: predicated region body
PF: predicated region fallthrough
CT: control target
= control target key end

     0   :  { %10 = vsyncpa [#allocation4], 0  ;;  %v1737_v2 = vmov 0.0|0.0   ;;  %v1738_v4 = vmov 0.0   ;;  %s2543_s0 = inlined_call_operand.vmem [shape: s32[2,1], index: 0, kind: input, shape index: {}]   ;;  %s2544_s1 = inlined_call_operand.vmem [shape: f32[2,128], index: 1, kind: input, shape index: {}]   ;;  %s2545_s2 = inlined_call_operand.vmem [shape: f32[2,500,128], index: 2, kind: input, shape index: {}]   ;;  %s2546_s3 = inlined_call_operand.hbm [shape: f32[2,500], index: 3, kind: output, shape index: {0}]   ;;  %s2547_s4 = inlined_call_operand.hbm [shape: f32[2,128], index: 4, kind: output, shape index: {1}]  }
   0x1   :  { %v51_v0 = vld [vmem:[%s2545_s2 + $0x100] sm:$0xff]  ;;  %v52_v1 = vld [vmem:[%s2545_s2 + $0x108] sm:$0xff]  ;;  %1394 = vmatprep.subr.bf16.mxu1 %v1737_v2  ;;  %217 = vmatprep.mubr.f32.mxu1 %v1738_v4  ;;  %v53_v5 = vld [vmem:[%s2545_s2 + $0x110] sm:$0xff] }
   0x2   :  { %v1395_v3 = vpack.c.bf16 %v52_v1, %v51_v0  ;;  %v54_v6 = vld [vmem:[%s2545_s2 + $0x118] sm:$0xff]  ;;  %v35_v7 = vld [vmem:[%s2545_s2 + $0x80] sm:$0xff]  ;;  %v36_v8 = vld [vmem:[%s2545_s2 + $0x88] sm:$0xff] }
   0x3   :  { %v1790_v9 = vpack.c.bf16 %v36_v8, %v35_v7  ;;  %v19_v10 = vld [vmem:[%s2545_s2] sm:$0xff]  ;;  %v20_v11 = vld [vmem:[%s2545_s2 + $0x8] sm:$0xff]  ;;  %v1398_v12 = vpack.c.bf16 %v54_v6, %v53_v5  ;;  %v37_v14 = vld [vmem:[%s2545_s2 + $0x90] sm:$0xff] }
   0x4   :  { %1396 = vmatpush1.bf16.xpose.msra.mxu1 %v1395_v3  ;;  %v1798_v13 = vpack.c.bf16 %v20_v11, %v19_v10  ;;  %v38_v15 = vld [vmem:[%s2545_s2 + $0x98] sm:$0xff]  ;;  %v21_v17 = vld [vmem:[%s2545_s2 + $0x10] sm:$0xff]  ;;  %v39_v19 = vld [vmem:[%s2545_s2 + $0xa0] sm:$0xff] }
   0x5   :  { %1397 = vmatprep.subr.bf16.mxu1 %v1737_v2  ;;  %1363 = vmatprep.subr.bf16.mxu0 %v1790_v9  ;;  %v1807_v16 = vpack.c.bf16 %v38_v15, %v37_v14  ;;  %v22_v18 = vld [vmem:[%s2545_s2 + $0x18] sm:$0xff]  ;;  %v40_v20 = vld [vmem:[%s2545_s2 + $0xa8] sm:$0xff]  ;;  %v55_v21 = vld [vmem:[%s2545_s2 + $0x120] sm:$0xff] }
   0x6   :  { %1365 = vmatpush3.bf16.xpose.msra.mxu0 %v1798_v13  ;;  %v56_v22 = vld [vmem:[%s2545_s2 + $0x128] sm:$0xff]  ;;  %v1830_v23 = vpack.c.bf16 %v22_v18, %v21_v17  ;;  %v1832_v24 = vpack.c.bf16 %v40_v20, %v39_v19  ;;  %v23_v26 = vld [vmem:[%s2545_s2 + $0x20] sm:$0xff]  ;;  %v41_v28 = vld [vmem:[%s2545_s2 + $0xb0] sm:$0xff] }
   0x7   :  { %1367 = vmatprep.subr.bf16.mxu0 %v1807_v16  ;;  %v1401_v25 = vpack.c.bf16 %v56_v22, %v55_v21  ;;  %v24_v27 = vld [vmem:[%s2545_s2 + $0x28] sm:$0xff]  ;;  %v42_v29 = vld [vmem:[%s2545_s2 + $0xb8] sm:$0xff]  ;;  %v57_v30 = vld [vmem:[%s2545_s2 + $0x130] sm:$0xff] }
   0x8   :  { %v58_v31 = vld [vmem:[%s2545_s2 + $0x138] sm:$0xff]  ;;  %v1855_v32 = vpack.c.bf16 %v24_v27, %v23_v26  ;;  %v1860_v33 = vld [vmem:[%s2544_s1] sm:$0x1]  ;;  %v1862_v34 = vpack.c.bf16 %v42_v29, %v41_v28 }
   0x9   :  { %1256 = vmatprep.mubr.f32.mxu0 %v1860_v33  ;;  %v1404_v35 = vpack.c.bf16 %v58_v31, %v57_v30 }
   0xc   :  { %1399 = vmatpush1.bf16.xpose.msra.mxu1 %v1398_v12 }
   0xd   :  { %1400 = vmatprep.subr.bf16.mxu1 %v1737_v2 }
   0xe   :  { %1369 = vmatpush3.bf16.xpose.msra.mxu0 %v1830_v23 }
   0xf   :  { %1371 = vmatprep.subr.bf16.mxu0 %v1832_v24 }
  0x14   :  { %1402 = vmatpush1.bf16.xpose.msra.mxu1 %v1401_v25 }
  0x15   :  { %1403 = vmatprep.subr.bf16.mxu1 %v1737_v2 }
  0x16   :  { %11 = vsyncpa [#allocation6], 0  ;;  %1373 = vmatpush3.bf16.xpose.msra.mxu0 %v1855_v32  ;;  %v25_v36 = vld [vmem:[%s2545_s2 + $0x30] sm:$0xff]  ;;  %v26_v37 = vld [vmem:[%s2545_s2 + $0x38] sm:$0xff]  ;;  %vm536_vm5 = vcmask 1041408   ;;  %vm540_vm6 = vcmask 943104  }
  0x17   :  { %1375 = vmatprep.subr.bf16.mxu0 %v1862_v34  ;;  %v43_v38 = vld [vmem:[%s2545_s2 + $0xc0] sm:$0xff]  ;;  %v44_v39 = vld [vmem:[%s2545_s2 + $0xc8] sm:$0xff]  ;;  %v1886_v42 = vpack.c.bf16 %v26_v37, %v25_v36  ;;  %v45_v47 = vld [vmem:[%s2545_s2 + $0xd0] sm:$0xff]  ;;  %vm690_vm7 = vcmask 1043456   ;;  %vm596_vm8 = vcmask 1043458   ;;  %vm598_vm10 = vcmask 1045508  }
  0x18   :  { %v59_v40 = vld [vmem:[%s2545_s2 + $0x140] sm:$0xff]  ;;  %v60_v41 = vld [vmem:[%s2545_s2 + $0x148] sm:$0xff]  ;;  %v1888_v43 = vpack.c.bf16 %v44_v39, %v43_v38  ;;  %v46_v48 = vld [vmem:[%s2545_s2 + $0xd8] sm:$0xff]  ;;  %vm600_vm12 = vcmask 949254   ;;  %vm687_vm14 = vcmask 949248  }
  0x19   :  { %v1407_v44 = vpack.c.bf16 %v60_v41, %v59_v40  ;;  %v27_v45 = vld [vmem:[%s2545_s2 + $0x40] sm:$0xff]  ;;  %v28_v46 = vld [vmem:[%s2545_s2 + $0x48] sm:$0xff]  ;;  %v61_v49 = vld [vmem:[%s2545_s2 + $0x150] sm:$0xff]  ;;  %v1913_v52 = vpack.c.bf16 %v46_v48, %v45_v47 }
  0x1a   :  { %v62_v50 = vld [vmem:[%s2545_s2 + $0x158] sm:$0xff]  ;;  %v1911_v51 = vpack.c.bf16 %v28_v46, %v27_v45  ;;  %v29_v54 = vld [vmem:[%s2545_s2 + $0x50] sm:$0xff]  ;;  %v47_v56 = vld [vmem:[%s2545_s2 + $0xe0] sm:$0xff] }
  0x1b   :  { %v1410_v53 = vpack.c.bf16 %v62_v50, %v61_v49  ;;  %v30_v55 = vld [vmem:[%s2545_s2 + $0x58] sm:$0xff]  ;;  %v48_v57 = vld [vmem:[%s2545_s2 + $0xe8] sm:$0xff]  ;;  %v63_v58 = vld [vmem:[%s2545_s2 + $0x160] sm:$0xff] }
  0x1c   :  { %1405 = vmatpush1.bf16.xpose.msra.mxu1 %v1404_v35  ;;  %v64_v59 = vld [vmem:[%s2545_s2 + $0x168] sm:$0xff]  ;;  %v1936_v60 = vpack.c.bf16 %v30_v55, %v29_v54  ;;  %v1938_v61 = vpack.c.bf16 %v48_v57, %v47_v56  ;;  %v31_v63 = vld [vmem:[%s2545_s2 + $0x60] sm:$0xff]  ;;  %v49_v1 = vld [vmem:[%s2545_s2 + $0xf0] sm:$0xff] }
  0x1d   :  { %1406 = vmatprep.subr.bf16.mxu1 %v1737_v2  ;;  %v1413_v62 = vpack.c.bf16 %v64_v59, %v63_v58  ;;  %v32_v0 = vld [vmem:[%s2545_s2 + $0x68] sm:$0xff]  ;;  %v50_v3 = vld [vmem:[%s2545_s2 + $0xf8] sm:$0xff]  ;;  %v65_v5 = vld [vmem:[%s2545_s2 + $0x170] sm:$0xff] }
  0x1e   :  { %1377 = vmatpush3.bf16.xpose.msra.mxu0 %v1886_v42  ;;  %v66_v6 = vld [vmem:[%s2545_s2 + $0x178] sm:$0xff]  ;;  %v1961_v7 = vpack.c.bf16 %v32_v0, %v31_v63  ;;  %v1963_v8 = vpack.c.bf16 %v50_v3, %v49_v1  ;;  %v33_v11 = vld [vmem:[%s2545_s2 + $0x70] sm:$0xff]  ;;  %v1111_v15 = vld [vmem:[%s2545_s2 + $0x280] sm:$0xff] }
  0x1f   :  { %1379 = vmatprep.subr.bf16.mxu0 %v1888_v43  ;;  %v1416_v10 = vpack.c.bf16 %v66_v6, %v65_v5  ;;  %v34_v12 = vld [vmem:[%s2545_s2 + $0x78] sm:$0xff]  ;;  %v67_v17 = vld [vmem:[%s2545_s2 + $0x180] sm:$0xff]  ;;  %v68_v18 = vld [vmem:[%s2545_s2 + $0x188] sm:$0xff] }
  0x20   :  { %v1110_v14 = vld [vmem:[%s2545_s2 + $0x278] sm:$0xff]  ;;  %v1986_v19 = vpack.c.bf16 %v34_v12, %v33_v11  ;;  %v1419_v21 = vpack.c.bf16 %v68_v18, %v67_v17  ;;  %v1095_v25 = vld [vmem:[%s2545_s2 + $0x200] sm:$0xff]  ;;  %v1112_v26 = vld [vmem:[%s2545_s2 + $0x288] sm:$0xff] }
  0x21   :  { %v1988_v20 = vpack.c.bf16 %v1111_v15, %v1110_v14  ;;  %v1094_v22 = vld [vmem:[%s2545_s2 + $0x1f8] sm:$0xff]  ;;  %v1113_v27 = vld [vmem:[%s2545_s2 + $0x290] sm:$0xff]  ;;  %v1096_v36 = vld [vmem:[%s2545_s2 + $0x208] sm:$0xff] }
  0x22   :  { %v69_v28 = vld [vmem:[%s2545_s2 + $0x190] sm:$0xff]  ;;  %v70_v29 = vld [vmem:[%s2545_s2 + $0x198] sm:$0xff]  ;;  %v2011_v30 = vpack.c.bf16 %v1095_v25, %v1094_v22  ;;  %v2013_v31 = vpack.c.bf16 %v1113_v27, %v1112_v26  ;;  %v1115_v39 = vld [vmem:[%s2545_s2 + $0x2a0] sm:$0xff] }
  0x23   :  { %v1422_v35 = vpack.c.bf16 %v70_v29, %v69_v28  ;;  %v1097_v37 = vld [vmem:[%s2545_s2 + $0x210] sm:$0xff]  ;;  %v1114_v38 = vld [vmem:[%s2545_s2 + $0x298] sm:$0xff]  ;;  %v71_v40 = vld [vmem:[%s2545_s2 + $0x1a0] sm:$0xff] }
  0x24   :  { %1408 = vmatpush1.bf16.xpose.msra.mxu1 %v1407_v44  ;;  %v72_v41 = vld [vmem:[%s2545_s2 + $0x1a8] sm:$0xff]  ;;  %v2037_v44 = vpack.c.bf16 %v1097_v37, %v1096_v36  ;;  %v2039_v45 = vpack.c.bf16 %v1115_v39, %v1114_v38  ;;  %v1098_v47 = vld [vmem:[%s2545_s2 + $0x218] sm:$0xff]  ;;  %v1099_v48 = vld [vmem:[%s2545_s2 + $0x220] sm:$0xff] }
  0x25   :  { %1409 = vmatprep.subr.bf16.mxu1 %v1737_v2  ;;  %v1425_v46 = vpack.c.bf16 %v72_v41, %v71_v40  ;;  %v1116_v49 = vld [vmem:[%s2545_s2 + $0x2a8] sm:$0xff]  ;;  %v1117_v50 = vld [vmem:[%s2545_s2 + $0x2b0] sm:$0xff]  ;;  %v74_v54 = vld [vmem:[%s2545_s2 + $0x1b8] sm:$0xff]  ;;  %v2062_v55 = vpack.c.bf16 %v1099_v48, %v1098_v47 }
  0x26   :  { %1381 = vmatpush3.bf16.xpose.msra.mxu0 %v1911_v51  ;;  %v2064_v56 = vpack.c.bf16 %v1117_v50, %v1116_v49  ;;  %v1100_v58 = vld [vmem:[%s2545_s2 + $0x228] sm:$0xff]  ;;  %v1101_v59 = vld [vmem:[%s2545_s2 + $0x230] sm:$0xff]  ;;  %v1119_v63 = vld [vmem:[%s2545_s2 + $0x2c0] sm:$0xff] }
  0x27   :  { %1383 = vmatprep.subr.bf16.mxu0 %v1913_v52  ;;  %v75_v0 = vld [vmem:[%s2545_s2 + $0x1c0] sm:$0xff]  ;;  %v76_v1 = vld [vmem:[%s2545_s2 + $0x1c8] sm:$0xff]  ;;  %v2087_v3 = vpack.c.bf16 %v1101_v59, %v1100_v58  ;;  %v1121_v14 = vld [vmem:[%s2545_s2 + $0x2d0] sm:$0xff] }
  0x28   :  { %v1431_v6 = vpack.c.bf16 %v76_v1, %v75_v0  ;;  %v1103_v11 = vld [vmem:[%s2545_s2 + $0x240] sm:$0xff]  ;;  %v1120_v12 = vld [vmem:[%s2545_s2 + $0x2c8] sm:$0xff]  ;;  %v77_v15 = vld [vmem:[%s2545_s2 + $0x1d0] sm:$0xff] }
  0x29   :  { %v78_v17 = vld [vmem:[%s2545_s2 + $0x1d8] sm:$0xff]  ;;  %v1104_v25 = vld [vmem:[%s2545_s2 + $0x248] sm:$0xff]  ;;  %v1105_v26 = vld [vmem:[%s2545_s2 + $0x250] sm:$0xff] }
  0x2a   :  { %v2116_v22 = vpack.c.bf16 %v78_v17, %v77_v15  ;;  %v1122_v27 = vld [vmem:[%s2545_s2 + $0x2d8] sm:$0xff]  ;;  %v1123_v28 = vld [vmem:[%s2545_s2 + $0x2e0] sm:$0xff]  ;;  %v2140_v36 = vpack.c.bf16 %v1105_v26, %v1104_v25  ;;  %v1124_v41 = vld [vmem:[%s2545_s2 + $0x2e8] sm:$0xff] }
  0x2b   :  { %v79_v29 = vld [vmem:[%s2545_s2 + $0x1e0] sm:$0xff]  ;;  %v2142_v37 = vpack.c.bf16 %v1123_v28, %v1122_v27  ;;  %v1106_v39 = vld [vmem:[%s2545_s2 + $0x258] sm:$0xff]  ;;  %v81_v50 = vld [vmem:[%s2545_s2 + $0x1f0] sm:$0xf] }
  0x2c   :  { %1411 = vmatpush1.bf16.xpose.msra.mxu1 %v1410_v53  ;;  %v73_v53 = vld [vmem:[%s2545_s2 + $0x1b0] sm:$0xff]  ;;  %v1107_v40 = vld [vmem:[%s2545_s2 + $0x260] sm:$0xff]  ;;  %v1146_v25 = vld [vmem:[%s2545_s2 + $0x398] sm:$0xff] }
  0x2d   :  { %1412 = vmatprep.subr.bf16.mxu1 %v1737_v2  ;;  %v1428_v57 = vpack.c.bf16 %v74_v54, %v73_v53  ;;  %v2162_v47 = vpack.c.bf16 %v1107_v40, %v1106_v39  ;;  %v2169_v49 = vld [vmem:[%s2544_s1 + $0x1] sm:$0x1]  ;;  %v1126_v53 = vld [vmem:[%s2545_s2 + $0x2f8] sm:$0xff]  ;;  %v1109_v58 = vld [vmem:[%s2545_s2 + $0x270] sm:$0xff] }
  0x2e   :  { %1385 = vmatpush3.bf16.xpose.msra.mxu0 %v1936_v60  ;;  %v1127_v54 = vld [vmem:[%s2545_s2 + $0x300] sm:$0xff]  ;;  %v1129_v0 = vld [vmem:[%s2545_s2 + $0x310] sm:$0xff]  ;;  %v1148_v28 = vld [vmem:[%s2545_s2 + $0x3a8] sm:$0xff] }
  0x2f   :  { %1387 = vmatprep.subr.bf16.mxu0 %v1938_v61  ;;  %v2189_v59 = vpack.c.bf16 %v1127_v54, %v1126_v53  ;;  %v1145_v15 = vld [vmem:[%s2545_s2 + $0x390] sm:$0xff]  ;;  %v1147_v26 = vld [vmem:[%s2545_s2 + $0x3a0] sm:$0xff]  ;;  %v1150_v39 = vld [vmem:[%s2545_s2 + $0x3b8] sm:$0xff] }
  0x30   :  { %v1502_v27 = vpack.c.bf16 %v1147_v26, %v1146_v25  ;;  %v1151_v40 = vld [vmem:[%s2545_s2 + $0x3c0] sm:$0xff]  ;;  %v1152_v53 = vld [vmem:[%s2545_s2 + $0x3c8] sm:$0xff]  ;;  %v1153_v54 = vld [vmem:[%s2545_s2 + $0x3d0] sm:$0xff] }
  0x31   :  { %vm597_vm9 = vmor %vm596_vm8, %vm536_vm5 }
  0x32   :  { %vm599_vm11 = vmor %vm598_vm10, %vm597_vm9 }
  0x33   :  { %vm601_vm13 = vmor %vm600_vm12, %vm599_vm11 }
  0x34   :  { %1414 = vmatpush1.bf16.xpose.msra.mxu1 %v1413_v62  ;;  %v1118_v62 = vld [vmem:[%s2545_s2 + $0x2b8] sm:$0xff] }
  0x35   :  { %1415 = vmatprep.subr.bf16.mxu1 %v1737_v2  ;;  %v2089_v5 = vpack.c.bf16 %v1119_v63, %v1118_v62  ;;  %v1128_v63 = vld [vmem:[%s2545_s2 + $0x308] sm:$0xff] }
  0x36   :  { %1389 = vmatpush3.bf16.xpose.msra.mxu0 %v1961_v7  ;;  %v2206_v1 = vpack.c.bf16 %v1129_v0, %v1128_v63  ;;  %v1155_v63 = vld [vmem:[%s2545_s2 + $0x3e0] sm:$0xff] }
  0x37   :  { %1391 = vmatprep.subr.bf16.mxu0 %v1963_v8 }
  0x3c   :  { %1417 = vmatpush1.bf16.xpose.msra.mxu1 %v1416_v10  ;;  %v1102_v10 = vld [vmem:[%s2545_s2 + $0x238] sm:$0xff] }
  0x3d   :  { %1418 = vmatprep.subr.bf16.mxu1 %v1737_v2  ;;  %v2112_v18 = vpack.c.bf16 %v1103_v11, %v1102_v10  ;;  %v1132_v10 = vld [vmem:[%s2545_s2 + $0x328] sm:$0xff]  ;;  %v1143_v11 = vld [vmem:[%s2545_s2 + $0x380] sm:$0xff] }
  0x3e   :  { %1393 = vmatpush3.bf16.xpose.msra.mxu0 %v1986_v19 }
  0x3f   :  { %1440 = vmatprep.subr.bf16.mxu0 %v1988_v20 }
  0x44   :  { %1420 = vmatpush1.bf16.xpose.msra.mxu1 %v1419_v21  ;;  %v2114_v21 = vpack.c.bf16 %v1121_v14, %v1120_v12  ;;  %v1144_v14 = vld [vmem:[%s2545_s2 + $0x388] sm:$0xff] }
  0x45   :  { %1421 = vmatprep.subr.bf16.mxu1 %v1737_v2  ;;  %1257 = vmatmul.mubr.f32.vlgmr.msra.gmra.mrb[0].mxu0 %v1860_v33  ;;  %v1499_v17 = vpack.c.bf16 %v1145_v15, %v1144_v14 }
  0x46   :  { %1442 = vmatpush3.bf16.xpose.msra.mxu0 %v2011_v30  ;;  %1290 = vmatprep.mubr.f32.mxu0 %v2169_v49 }
  0x47   :  { %1444 = vmatprep.subr.bf16.mxu0 %v2013_v31 }
  0x4c   :  { %1423 = vmatpush1.bf16.xpose.msra.mxu1 %v1422_v35  ;;  %v80_v35 = vld [vmem:[%s2545_s2 + $0x1e8] sm:$0xff] }
  0x4d   :  { %1424 = vmatprep.subr.bf16.mxu1 %v1737_v2  ;;  %v2144_v38 = vpack.c.bf16 %v80_v35, %v79_v29  ;;  %v1149_v29 = vld [vmem:[%s2545_s2 + $0x3b0] sm:$0xff] }
  0x4e   :  { %1446 = vmatpush3.bf16.xpose.msra.mxu0 %v2037_v44  ;;  %v1505_v35 = vpack.c.bf16 %v1149_v29, %v1148_v28 }
  0x4f   :  { %1448 = vmatprep.subr.bf16.mxu0 %v2039_v45 }
  0x54   :  { %1426 = vmatpush1.bf16.xpose.msra.mxu1 %v1425_v46  ;;  %v1125_v46 = vld [vmem:[%s2545_s2 + $0x2f0] sm:$0xff] }
  0x55   :  { %1427 = vmatprep.subr.bf16.mxu1 %v1737_v2  ;;  %v2164_v48 = vpack.c.bf16 %v1125_v46, %v1124_v41  ;;  %v1508_v41 = vpack.c.bf16 %v1151_v40, %v1150_v39  ;;  %v502_v46 = vld [vmem:[%s2543_s0] sm:$0x3] }
  0x56   :  { %1450 = vmatpush3.bf16.xpose.msra.mxu0 %v2062_v55 }
  0x57   :  { %1452 = vmatprep.subr.bf16.mxu0 %v2064_v56 }
  0x5c   :  { %1429 = vmatpush1.bf16.xpose.msra.mxu1 %v1428_v57  ;;  %v1108_v57 = vld [vmem:[%s2545_s2 + $0x268] sm:$0xff] }
  0x5d   :  { %1430 = vmatprep.subr.bf16.mxu1 %v1737_v2  ;;  %v2192_v62 = vpack.c.bf16 %v1109_v58, %v1108_v57  ;;  %v1511_v57 = vpack.c.bf16 %v1153_v54, %v1152_v53  ;;  %v1154_v58 = vld [vmem:[%s2545_s2 + $0x3d8] sm:$0xff] }
  0x5e   :  { %1454 = vmatpush3.bf16.xpose.msra.mxu0 %v2087_v3  ;;  %v1514_v0 = vpack.c.bf16 %v1155_v63, %v1154_v58 }
  0x5f   :  { %1456 = vmatprep.subr.bf16.mxu0 %v2089_v5 }
  0x64   :  { %1432 = vmatpush1.bf16.xpose.msra.mxu1 %v1431_v6  ;;  %v1131_v6 = vld [vmem:[%s2545_s2 + $0x320] sm:$0xff] }
  0x65   :  { %1433 = vmatprep.subr.bf16.mxu1 %v1737_v2 }
  0x66   :  { %1458 = vmatpush3.bf16.xpose.msra.mxu0 %v2112_v18 }
  0x67   :  { %1460 = vmatprep.subr.bf16.mxu0 %v2114_v21 }
  0x6c   :  { %1435 = vmatpush1.bf16.xpose.msra.mxu1 %v2116_v22 }
  0x6d   :  { %1436 = vmatprep.subr.bf16.mxu1 %v1737_v2 }
  0x6e   :  { %1462 = vmatpush3.bf16.xpose.msra.mxu0 %v2140_v36 }
  0x6f   :  { %1464 = vmatprep.subr.bf16.mxu0 %v2142_v37 }
  0x74   :  { %1438 = vmatpush1.bf16.xpose.msra.mxu1 %v2144_v38 }
  0x75   :  { %213 = vmatprep.subr.mxu1 %v1738_v4 }
  0x76   :  { %1466 = vmatpush3.bf16.xpose.msra.mxu0 %v2162_v47 }
  0x77   :  { %1468 = vmatprep.subr.bf16.mxu0 %v2164_v48 }
  0x7c   :  { %214 = vmatpush1.xpose.msra.mxu1 %v81_v50  ;;  %v1739_v50 = vmov 0  }
  0x7d   :  { %1471 = vmatprep.subr.bf16.mxu1 %v1737_v2  ;;  %1677 = vset.pattern.permute.xlu0 %v1739_v50 }
  0x7e   :  { %1470 = vmatpush3.bf16.xpose.msra.mxu0 %v2192_v62  ;;  %504 = vperm.xlu0 %1677, %v502_v46  }
  0x7f   :  { %218 = vmatmul.mubr.f32.vlgmr.msra.gmra.mrb[0].mxu1 %v1860_v33  ;;  %1517 = vmatprep.subr.bf16.mxu0 %v1790_v9  ;;  %v1130_v33 = vld [vmem:[%s2545_s2 + $0x318] sm:$0xff] }
  0x80   :  { %1473 = vmatpush1.bf16.xpose.msra.mxu1 %v2189_v59  ;;  %458 = vmatprep.mubr.f32.mxu1 %v1738_v4  ;;  %v2219_v9 = vpack.c.bf16 %v1131_v6, %v1130_v33  ;;  %v1156_v33 = vld [vmem:[%s2545_s2 + $0x3e8] sm:$0xf]  ;;  %v1740_v6 = vmov 1966171168  }
  0x81   :  { %1474 = vmatprep.subr.bf16.mxu1 %v1737_v2 }
  0x85   :  { %1291 = vmatmul.mubr.f32.vlgmr.msra.gmra.mrb[2].mxu0 %v2169_v49 }
  0x86   :  { %1519 = vmatpush3.bf16.msra.mxu0 %v1798_v13  ;;  %v1133_v13 = vld [vmem:[%s2545_s2 + $0x330] sm:$0xff] }
  0x87   :  { %1521 = vmatprep.subr.bf16.mxu0 %v1807_v16  ;;  %v2233_v16 = vpack.c.bf16 %v1133_v13, %v1132_v10  ;;  %v233_v10 = vlaneseq }
  0x88   :  { %1476 = vmatpush1.bf16.xpose.msra.mxu1 %v2206_v1 }
  0x89   :  { %1477 = vmatprep.subr.bf16.mxu1 %v1737_v2  ;;  %vm255_vm0 = vcmp.lt.s32.totalorder %v233_v10, 500  ;;  %v498_v28 = vand.u32 127, %v233_v10 }
  0x8a   :  { %1523 = vmatpush3.bf16.msra.mxu0 %v1830_v23  ;;  %v1134_v23 = vld [vmem:[%s2545_s2 + $0x338] sm:$0xff] }
  0x8b   :  { %1525 = vmatprep.subr.bf16.mxu0 %v1832_v24  ;;  %v1135_v24 = vld [vmem:[%s2545_s2 + $0x340] sm:$0xff]  ;;  %v500_v39 = vadd.s32 256, %v498_v28 }
  0x8e   :  { %1527 = vmatpush3.bf16.msra.mxu0 %v1855_v32  ;;  %v2247_v32 = vpack.c.bf16 %v1135_v24, %v1134_v23 }
  0x8f   :  { %1529 = vmatprep.subr.bf16.mxu0 %v1862_v34  ;;  %v1136_v34 = vld [vmem:[%s2545_s2 + $0x348] sm:$0xff] }
  0x90   :  { %1479 = vmatpush1.bf16.xpose.msra.mxu1 %v2219_v9 }
  0x91   :  { %1480 = vmatprep.subr.bf16.mxu1 %v1737_v2 }
  0x92   :  { %1531 = vmatpush3.bf16.msra.mxu0 %v1886_v42  ;;  %v1137_v42 = vld [vmem:[%s2545_s2 + $0x350] sm:$0xff] }
  0x93   :  { %1533 = vmatprep.subr.bf16.mxu0 %v1888_v43  ;;  %v2261_v43 = vpack.c.bf16 %v1137_v42, %v1136_v34 }
  0x96   :  { %1535 = vmatpush3.bf16.msra.mxu0 %v1911_v51  ;;  %v1138_v51 = vld [vmem:[%s2545_s2 + $0x358] sm:$0xff] }
  0x97   :  { %1537 = vmatprep.subr.bf16.mxu0 %v1913_v52  ;;  %v1139_v52 = vld [vmem:[%s2545_s2 + $0x360] sm:$0xff] }
  0x98   :  { %1482 = vmatpush1.bf16.xpose.msra.mxu1 %v2233_v16 }
  0x99   :  { %1483 = vmatprep.subr.bf16.mxu1 %v1737_v2 }
  0x9a   :  { %1539 = vmatpush3.bf16.msra.mxu0 %v1936_v60  ;;  %v1490_v60 = vpack.c.bf16 %v1139_v52, %v1138_v51 }
  0x9b   :  { %1541 = vmatprep.subr.bf16.mxu0 %v1938_v61  ;;  %v1140_v61 = vld [vmem:[%s2545_s2 + $0x368] sm:$0xff] }
  0x9e   :  { %1543 = vmatpush3.bf16.msra.mxu0 %v1961_v7  ;;  %v1141_v7 = vld [vmem:[%s2545_s2 + $0x370] sm:$0xff] }
  0x9f   :  { %1545 = vmatprep.subr.bf16.mxu0 %v1963_v8  ;;  %v1493_v8 = vpack.c.bf16 %v1141_v7, %v1140_v61 }
  0xa0   :  { %1485 = vmatpush1.bf16.xpose.msra.mxu1 %v2247_v32 }
  0xa1   :  { %1486 = vmatprep.subr.bf16.mxu1 %v1737_v2 }
  0xa2   :  { %1547 = vmatpush3.bf16.msra.mxu0 %v1986_v19  ;;  %v1142_v19 = vld [vmem:[%s2545_s2 + $0x378] sm:$0xff] }
  0xa3   :  { %1548 = vmatprep.subr.bf16.mxu0 %v1737_v2  ;;  %v1496_v12 = vpack.c.bf16 %v1143_v11, %v1142_v19 }
  0xa8   :  { %1488 = vmatpush1.bf16.xpose.msra.mxu1 %v2261_v43 }
  0xa9   :  { %1489 = vmatprep.subr.bf16.mxu1 %v1737_v2 }
  0xb0   :  { %1491 = vmatpush1.bf16.xpose.msra.mxu1 %v1490_v60 }
  0xb1   :  { %1492 = vmatprep.subr.bf16.mxu1 %v1737_v2 }
  0xb8   :  { %1494 = vmatpush1.bf16.xpose.msra.mxu1 %v1493_v8 }
  0xb9   :  { %1495 = vmatprep.subr.bf16.mxu1 %v1737_v2 }
  0xc0   :  { %1497 = vmatpush1.bf16.xpose.msra.mxu1 %v1496_v12 }
  0xc1   :  { %1498 = vmatprep.subr.bf16.mxu1 %v1737_v2 }
  0xc8   :  { %1500 = vmatpush1.bf16.xpose.msra.mxu1 %v1499_v17 }
  0xc9   :  { %1501 = vmatprep.subr.bf16.mxu1 %v1737_v2 }
  0xd0   :  { %1503 = vmatpush1.bf16.xpose.msra.mxu1 %v1502_v27 }
  0xd1   :  { %1504 = vmatprep.subr.bf16.mxu1 %v1737_v2 }
  0xd8   :  { %1506 = vmatpush1.bf16.xpose.msra.mxu1 %v1505_v35 }
  0xd9   :  { %1507 = vmatprep.subr.bf16.mxu1 %v1737_v2 }
  0xe0   :  { %1509 = vmatpush1.bf16.xpose.msra.mxu1 %v1508_v41 }
  0xe1   :  { %1510 = vmatprep.subr.bf16.mxu1 %v1737_v2 }
  0xe8   :  { %1512 = vmatpush1.bf16.xpose.msra.mxu1 %v1511_v57 }
  0xe9   :  { %1513 = vmatprep.subr.bf16.mxu1 %v1737_v2 }
  0xf0   :  { %1515 = vmatpush1.bf16.xpose.msra.mxu1 %v1514_v0 }
  0xf1   :  { %454 = vmatprep.subr.mxu1 %v1738_v4 }
  0xf8   :  { %455 = vmatpush1.xpose.msra.mxu1 %v1156_v33 }
  0xf9   :  { %1625 = vmatprep.subr.bf16.mxu1 %v1737_v2 }
  0xfb   :  { %459 = vmatmul.mubr.f32.vlgmr.msra.gmra.mrb[2].mxu1 %v2169_v49 }
  0xfc   :  { %1627 = vmatpush1.bf16.msra.mxu1 %v2189_v59 }
  0xfd   :  { %1628 = vmatprep.subr.bf16.mxu1 %v1737_v2  ;;  %v505_v40 = vpop.permute.xlu0 %504 }
  0xfe   :  { %vm506_vm1 = vcmp.ge.s32.totalorder %v498_v28, %v505_v40  ;;  %vm508_vm3 = vcmp.ge.s32.totalorder %v500_v39, %v505_v40 }
 0x100   :  { %1630 = vmatpush1.bf16.msra.mxu1 %v2206_v1 }
 0x101   :  { %1631 = vmatprep.subr.bf16.mxu1 %v1737_v2 }
 0x104   :  { %1633 = vmatpush1.bf16.msra.mxu1 %v2219_v9  ;;  %v231_v9 = vunpack.c.l.s4 %v1740_v6 }
 0x105   :  { %1634 = vmatprep.subr.bf16.mxu1 %v1737_v2 }
 0x106   :  { %v232_v13 = vunpack.c.0.s8 %v231_v9 }
 0x108   :  { %1636 = vmatpush1.bf16.msra.mxu1 %v2233_v16  ;;  %v2359_v16 = vshrl.u32 %v233_v10, 7 }
 0x109   :  { %1637 = vmatprep.subr.bf16.mxu1 %v1737_v2 }
 0x10a   :  { %v235_v23 = vsub.s32 %v232_v13, %v2359_v16 }
 0x10c   :  { %1639 = vmatpush1.bf16.msra.mxu1 %v2247_v32 }
 0x10d   :  { %1640 = vmatprep.subr.bf16.mxu1 %v1737_v2 }
 0x110   :  { %1642 = vmatpush1.bf16.msra.mxu1 %v2261_v43 }
 0x111   :  { %1643 = vmatprep.subr.bf16.mxu1 %v1737_v2 }
 0x114   :  { %1645 = vmatpush1.bf16.msra.mxu1 %v1490_v60 }
 0x115   :  { %1646 = vmatprep.subr.bf16.mxu1 %v1737_v2 }
 0x118   :  { %1648 = vmatpush1.bf16.msra.mxu1 %v1493_v8  ;;  %v148_v49 = vpop.f32.mrb[0].mxu0 }
 0x119   :  { %1649 = vmatprep.subr.bf16.mxu1 %v1737_v2  ;;  %v150_v59 = vpop.f32.mrb[1].mxu0 }
 0x11a   :  { %v228_v1 = vcombine.low %v148_v49, %v150_v59 }
 0x11c   :  { %1651 = vmatpush1.bf16.msra.mxu1 %v1496_v12  ;;  %v236_v34 = vrot.slane %v228_v1, %v235_v23 }
 0x11d   :  { %1652 = vmatprep.subr.bf16.mxu1 %v1737_v2 }
 0x120   :  { %1654 = vmatpush1.bf16.msra.mxu1 %v1499_v17  ;;  %v1741_v17 = vmov 1983009808  }
 0x121   :  { %1655 = vmatprep.subr.bf16.mxu1 %v1737_v2  ;;  %v513_v25 = vunpack.c.l.s4 %v1741_v17 }
 0x124   :  { %1657 = vmatpush1.bf16.msra.mxu1 %v1502_v27  ;;  %v514_v27 = vunpack.c.0.s8 %v513_v25 }
 0x125   :  { %1658 = vmatprep.subr.bf16.mxu1 %v1737_v2 }
 0x126   :  { %v2363_v29 = vsub.s32 %v514_v27, %v2359_v16 }
 0x128   :  { %1660 = vmatpush1.bf16.msra.mxu1 %v1505_v35  ;;  %v499_v35 = vadd.s32 128, %v498_v28 }
 0x129   :  { %1661 = vmatprep.subr.bf16.mxu1 %v1737_v2 }
 0x12a   :  { %vm507_vm2 = vcmp.ge.s32.totalorder %v499_v35, %v505_v40 }
 0x12c   :  { %1663 = vmatpush1.bf16.msra.mxu1 %v1508_v41  ;;  %v501_v41 = vadd.s32 384, %v498_v28  ;;  %v1221_v28 = vld [vmem:[%s2545_s2 + $0x3e8] sm:$0xf] }
 0x12d   :  { %1664 = vmatprep.subr.bf16.mxu1 %v1737_v2 }
 0x12e   :  { %vm509_vm4 = vcmp.ge.s32.totalorder %v501_v41, %v505_v40 }
 0x130   :  { %1666 = vmatpush1.bf16.msra.mxu1 %v1511_v57 }
 0x131   :  { %1667 = vmatprep.subr.bf16.mxu1 %v1737_v2 }
 0x134   :  { %1669 = vmatpush1.bf16.msra.mxu1 %v1514_v0 }
 0x135   :  { %1055 = vmatprep.subr.mxu1 %v1738_v4 }
 0x138   :  { %1222 = vmatpush1.msk.msra.mxu1 %vm690_vm7, %v1221_v28  ;;  %v648_v28 = vld [vmem:[%s2545_s2 + $0x160] sm:$0xff] }
 0x152   :  { %v219_v24 = vpop.f32.mrb[0].mxu1 }
 0x153   :  { %v221_v32 = vpop.f32.mrb[1].mxu1 }
 0x154   :  { %v229_v42 = vcombine.low %v219_v24, %v221_v32 }
 0x156   :  { %v243_v43 = vrot.slane %v229_v42, %v235_v23 }
 0x158   :  { %v244_v51 = vcombine.low %v236_v34, %v243_v43  ;;  %v389_v60 = vpop.f32.mrb[2].mxu0 }
 0x159   :  { %v391_v61 = vpop.f32.mrb[3].mxu0 }
 0x15a   :  { %v251_v52 = vrot.slane %v244_v51, %v235_v23  ;;  %v469_v7 = vcombine.low %v389_v60, %v391_v61 }
 0x15c   :  { %257 = vst.msk [vmem:[#allocation2] ss:$2 sm:$0xf] %vm255_vm0, %v251_v52  ;;  %v477_v11 = vrot.slane %v469_v7, %v235_v23 }
 0x1ce   :  { %v460_v8 = vpop.f32.mrb[2].mxu1 }
 0x1cf   :  { %v462_v19 = vpop.f32.mrb[3].mxu1 }
 0x1d0   :  { %v470_v12 = vcombine.low %v460_v8, %v462_v19 }
 0x1d2   :  { %v484_v14 = vrot.slane %v470_v12, %v235_v23 }
 0x1d4   :  { %v485_v15 = vcombine.low %v477_v11, %v484_v14 }
 0x1d6   :  { %v492_v26 = vrot.slane %v485_v15, %v235_v23 }
 0x1d8   :  { %495 = vst.msk [vmem:[#allocation2 + $0x1] ss:$2 sm:$0xf] %vm255_vm0, %v492_v26 }
 0x1df   :  { %v496_v46 = vld [vmem:[#allocation2] sm:$0xff] }
 0x1e0   :  { %v511_v50 = vcombine.high %v496_v46, %v496_v46  ;;  %v518_v53 = vrot.slane %v496_v46, %v2363_v29 }
 0x1e2   :  { %v525_v54 = vrot.slane %v511_v50, %v2363_v29  ;;  %v526_v57 = vcombine.high %v518_v53, %v518_v53  ;;  %v532_v63 = vsel %vm506_vm1, -inf, %v518_v53 }
 0x1e3   :  { %v537_v1 = vsel %vm536_vm5, %v532_v63, -inf }
 0x1e4   :  { %v527_v58 = vcombine.high %v525_v54, %v525_v54  ;;  %v533_v0 = vsel %vm507_vm2, -inf, %v526_v57  ;;  %v534_v33 = vsel %vm508_vm3, -inf, %v525_v54 }
 0x1e5   :  { %v538_v49 = vsel %vm536_vm5, %v533_v0, -inf  ;;  %v539_v6 = vsel %vm536_vm5, %v534_v33, -inf }
 0x1e6   :  { %v535_v59 = vsel %vm509_vm4, -inf, %v527_v58  ;;  %v542_v10 = vmax.f32 %v537_v1, %v538_v49  ;;  %v670_v49 = vsub.s32 0, %v2359_v16  ;;  %v637_v1 = vld [vmem:[%s2545_s2 + $0x108] sm:$0xff] }
 0x1e7   :  { %v541_v9 = vsel %vm540_vm6, %v535_v59, -inf }
 0x1e8   :  { %v543_v13 = vmax.f32 %v539_v6, %v541_v9  ;;  %v678_v6 = vsub.s32 2, %v2359_v16 }
 0x1ea   :  { %v544_v23 = vmax.f32 %v542_v10, %v543_v13 }
 0x1ec   :  { %545 = vmax.xlane.f32.xlu0 %v544_v23 }
 0x279   :  { %v546_v24 = vpop.xlane.xlu0 %545 }
 0x27a   :  { %v547_v32 = vsub.f32 %v532_v63, %v546_v24  ;;  %v548_v34 = vsub.f32 %v533_v0, %v546_v24  ;;  %v549_v42 = vsub.f32 %v534_v33, %v546_v24  ;;  %v550_v43 = vsub.f32 %v535_v59, %v546_v24  ;;  %v636_v59 = vld [vmem:[%s2545_s2 + $0x100] sm:$0xff] }
 0x27b   :  { %v674_v0 = vsub.s32 1, %v2359_v16  ;;  %v682_v33 = vsub.s32 3, %v2359_v16  ;;  %v1549_v10 = vpack.c.bf16 %v637_v1, %v636_v59  ;;  %v658_v59 = vld [vmem:[%s2545_s2 + $0x1b0] sm:$0xff]  ;;  %v659_v1 = vld [vmem:[%s2545_s2 + $0x1b8] sm:$0xff] }
 0x27c   :  { %v551_v51 = vmul.f32 1.442695, %v547_v32  ;;  %v553_v52 = vmul.f32 1.442695, %v548_v34  ;;  %v555_v60 = vmul.f32 1.442695, %v549_v42 }
 0x27d   :  { %v557_v61 = vmul.f32 1.442695, %v550_v43  ;;  %v638_v34 = vld [vmem:[%s2545_s2 + $0x110] sm:$0xff]  ;;  %v639_v42 = vld [vmem:[%s2545_s2 + $0x118] sm:$0xff] }
 0x27e   :  { %1679 = vpow2.f32 %v551_v51 }
 0x27f   :  { %1681 = vpow2.f32 %v553_v52 }
 0x280   :  { %1683 = vpow2.f32 %v555_v60  ;;  %v1552_v60 = vpack.c.bf16 %v639_v42, %v638_v34 }
 0x281   :  { %1685 = vpow2.f32 %v557_v61  ;;  %v640_v61 = vld [vmem:[%s2545_s2 + $0x120] sm:$0xff] }
 0x288   :  { %v1680_v7 = vpop.eup %1679 }
 0x289   :  { %v1682_v8 = vpop.eup %1681  ;;  %v559_v19 = vsel %vm536_vm5, %v1680_v7, 0.0 }
 0x28a   :  { %v1684_v11 = vpop.eup %1683  ;;  %v560_v12 = vsel %vm536_vm5, %v1682_v8, 0.0 }
 0x28b   :  { %v1686_v14 = vpop.eup %1685  ;;  %v561_v15 = vadd.f32 %v560_v12, %v559_v19  ;;  %v562_v17 = vsel %vm536_vm5, %v1684_v11, 0.0  ;;  %v642_v19 = vld [vmem:[%s2545_s2 + $0x130] sm:$0xff] }
 0x28c   :  { %v564_v26 = vsel %vm540_vm6, %v1686_v14, 0.0 }
 0x28d   :  { %v563_v25 = vadd.f32 %v562_v17, %v561_v15  ;;  %v645_v15 = vld [vmem:[%s2545_s2 + $0x148] sm:$0xff] }
 0x28f   :  { %v565_v27 = vadd.f32 %v564_v26, %v563_v25  ;;  %v646_v25 = vld [vmem:[%s2545_s2 + $0x150] sm:$0xff]  ;;  %v647_v26 = vld [vmem:[%s2545_s2 + $0x158] sm:$0xff] }
 0x291   :  { %566 = vadd.xlane.f32.xlu1 %v565_v27  ;;  %v1564_v27 = vpack.c.bf16 %v647_v26, %v646_v25 }
 0x31e   :  { %v567_v35 = vpop.xlane.xlu1 %566 }
 0x31f   :  { %1687 = vrcp.f32 %v567_v35  ;;  %v649_v35 = vld [vmem:[%s2545_s2 + $0x168] sm:$0xff] }
 0x329   :  { %v1688_v39 = vpop.eup %1687 }
 0x32a   :  { %v570_v40 = vmul.f32 %v1688_v39, %v1680_v7  ;;  %v571_v41 = vmul.f32 %v1688_v39, %v1682_v8  ;;  %v572_v46 = vmul.f32 %v1688_v39, %v1684_v11  ;;  %v573_v50 = vmul.f32 %v1688_v39, %v1686_v14  ;;  %v641_v7 = vld [vmem:[%s2545_s2 + $0x128] sm:$0xff]  ;;  %v643_v11 = vld [vmem:[%s2545_s2 + $0x138] sm:$0xff]  ;;  %v644_v14 = vld [vmem:[%s2545_s2 + $0x140] sm:$0xff] }
 0x32b   :  { %v1555_v8 = vpack.c.bf16 %v641_v7, %v640_v61  ;;  %v1558_v12 = vpack.c.bf16 %v643_v11, %v642_v19  ;;  %v1561_v17 = vpack.c.bf16 %v645_v15, %v644_v14  ;;  %v1567_v39 = vpack.c.bf16 %v649_v35, %v648_v28 }
 0x32c   :  { %v578_v53 = vcombine.low %v570_v40, %v571_v41  ;;  %v579_v54 = vcombine.low %v572_v46, %v573_v50  ;;  %v650_v40 = vld [vmem:[%s2545_s2 + $0x170] sm:$0xff]  ;;  %v651_v41 = vld [vmem:[%s2545_s2 + $0x178] sm:$0xff]  ;;  %v652_v50 = vld [vmem:[%s2545_s2 + $0x180] sm:$0xff] }
 0x32d   :  { %v1570_v46 = vpack.c.bf16 %v651_v41, %v650_v40 }
 0x32e   :  { %v586_v57 = vrot.slane %v578_v53, %v2363_v29  ;;  %v593_v58 = vrot.slane %v579_v54, %v2363_v29  ;;  %v653_v53 = vld [vmem:[%s2545_s2 + $0x188] sm:$0xff] }
 0x32f   :  { %v1573_v54 = vpack.c.bf16 %v653_v53, %v652_v50 }
 0x330   :  { %v594_v63 = vcombine.low %v586_v57, %v593_v58  ;;  %v654_v57 = vld [vmem:[%s2545_s2 + $0x190] sm:$0xff]  ;;  %v655_v58 = vld [vmem:[%s2545_s2 + $0x198] sm:$0xff] }
 0x332   :  { %602 = vst.msk [vmem:[#allocation3] sm:$0xff] %vm601_vm13, %v594_v63  ;;  %v1576_v63 = vpack.c.bf16 %v655_v58, %v654_v57 }
 0x339   :  { %v2392_v29 = vld [vmem:[#allocation3] ss:$2 sm:$0xf]  ;;  %v836_v9 = vld [vmem:[#allocation3 + $0x1] ss:$2 sm:$0xf] }
 0x33a   :  { %v675_v13 = vrot.slane %v2392_v29, %v674_v0  ;;  %v916_v23 = vrot.slane %v836_v9, %v682_v33  ;;  %v671_v24 = vrot.slane %v2392_v29, %v670_v49  ;;  %v912_v32 = vrot.slane %v836_v9, %v678_v6 }
 0x33b   :  { %v2404_v43 = vrot.slane %v836_v9, %v674_v0  ;;  %v2406_v51 = vrot.slane %v836_v9, %v670_v49  ;;  %v683_v52 = vrot.slane %v2392_v29, %v682_v33  ;;  %v656_v0 = vld [vmem:[%s2545_s2 + $0x1a0] sm:$0xff]  ;;  %v657_v33 = vld [vmem:[%s2545_s2 + $0x1a8] sm:$0xff]  ;;  %v1582_v9 = vpack.c.bf16 %v659_v1, %v658_v59 }
 0x33c   :  { %758 = vmatprep.mubr.f32.mxu0 %v675_v13  ;;  %1223 = vmatprep.mubr.msk.f32.mxu1 %vm687_vm14, %v916_v23  ;;  %v1579_v49 = vpack.c.bf16 %v657_v33, %v656_v0  ;;  %v661_v13 = vld [vmem:[%s2545_s2 + $0x1c8] sm:$0xff] }
 0x33d   :  { %759 = vmatmul.mubr.f32.vlgmr.msra.gmra.mrb[4].mxu0 %v671_v24  ;;  %1060 = vmatmul.mubr.f32.vlgmr.msra.gmra.mrb[4].mxu1 %v912_v32  ;;  %v666_v24 = vld [vmem:[%s2545_s2 + $0x1f0] sm:$0xf]  ;;  %v679_v32 = vrot.slane %v2392_v29, %v678_v6 }
 0x33e   :  { %1550 = vmatpush1.bf16.msra.mxu0 %v1549_v10  ;;  %1158 = vmatprep.mubr.msk.f32.mxu0 %vm687_vm14, %v683_v52  ;;  %v660_v10 = vld [vmem:[%s2545_s2 + $0x1c0] sm:$0xff]  ;;  %s1742_s2 = smov [#allocation3]  }
 0x33f   :  { %1551 = vmatprep.subr.bf16.mxu0 %v1737_v2  ;;  %v1585_v23 = vpack.c.bf16 %v661_v13, %v660_v10  ;;  %s1072_s9 = sshll.u32 %s1742_s2, 4  ;;  %s1073_s9 = int_to_ptr.vmem [resolvable:$true] %s1072_s9 }
 0x340   :  { %s1689_s10 = scalar_lea.vmem %s1073_s9, 128  ;;  %p1694_p1 = scmp.lt.s32.totalorder %s1073_s9, %s1073_s9 }
 0x341   :  { %p1690_p0 = scmp.ne.s32.totalorder %s1073_s9, %s1689_s10  ;;  %p1695_p2 = scmp.lt.s32.totalorder %s1689_s10, %s1689_s10 }
 0x342   :  { %1553 = vmatpush1.bf16.msra.mxu0 %v1552_v60 }
 0x343   :  { %1554 = vmatprep.subr.bf16.mxu0 %v1737_v2  ;;  %p1696_p3 = por %p1695_p2, %p1694_p1 }
 0x345   :  { %p1697_p4 = pnand %p1696_p3, %p1690_p0 }
 0x346   :  { %1556 = vmatpush1.bf16.msra.mxu0 %v1555_v8 }
 0x347   :  { %1557 = vmatprep.subr.bf16.mxu0 %v1737_v2 }
 0x34a   :  { %1559 = vmatpush1.bf16.msra.mxu0 %v1558_v12 }
 0x34b   :  { %1560 = vmatprep.subr.bf16.mxu0 %v1737_v2 }
 0x34e   :  { %1562 = vmatpush1.bf16.msra.mxu0 %v1561_v17 }
 0x34f   :  { %1563 = vmatprep.subr.bf16.mxu0 %v1737_v2 }
 0x352   :  { %1565 = vmatpush1.bf16.msra.mxu0 %v1564_v27 }
 0x353   :  { %1566 = vmatprep.subr.bf16.mxu0 %v1737_v2 }
 0x356   :  { %1568 = vmatpush1.bf16.msra.mxu0 %v1567_v39 }
 0x357   :  { %1569 = vmatprep.subr.bf16.mxu0 %v1737_v2 }
 0x35a   :  { %1571 = vmatpush1.bf16.msra.mxu0 %v1570_v46 }
 0x35b   :  { %1572 = vmatprep.subr.bf16.mxu0 %v1737_v2 }
 0x35e   :  { %1574 = vmatpush1.bf16.msra.mxu0 %v1573_v54 }
 0x35f   :  { %1575 = vmatprep.subr.bf16.mxu0 %v1737_v2 }
 0x362   :  { %1577 = vmatpush1.bf16.msra.mxu0 %v1576_v63 }
 0x363   :  { %1578 = vmatprep.subr.bf16.mxu0 %v1737_v2 }
 0x366   :  { %1580 = vmatpush1.bf16.msra.mxu0 %v1579_v49 }
 0x367   :  { %1581 = vmatprep.subr.bf16.mxu0 %v1737_v2 }
 0x36a   :  { %1583 = vmatpush1.bf16.msra.mxu0 %v1582_v9 }
 0x36b   :  { %1584 = vmatprep.subr.bf16.mxu0 %v1737_v2 }
 0x36e   :  { %1586 = vmatpush1.bf16.msra.mxu0 %v1585_v23 }
 0x36f   :  { %1587 = vmatprep.subr.bf16.mxu0 %v1737_v2 }
 0x372   :  { %1589 = vmatpush1.bf16.msra.mxu0 %v2116_v22 }
 0x373   :  { %1590 = vmatprep.subr.bf16.mxu0 %v1737_v2 }
 0x376   :  { %1592 = vmatpush1.bf16.msra.mxu0 %v2144_v38 }
 0x377   :  { %824 = vmatprep.subr.mxu0 %v1738_v4 }
 0x37a   :  { %1157 = vmatpush1.msk.msra.mxu0 %vm690_vm7, %v666_v24 }
 0x37b   :  { %829 = vmatmul.mubr.f32.vlgmr.msra.gmra.mrb[6].mxu0 %v679_v32  ;;  %1594 = vmatprep.subr.bf16.mxu0 %v1988_v20 }
 0x37c   :  { %1596 = vmatpush3.bf16.msra.mxu0 %v2011_v30  ;;  %989 = vmatprep.mubr.f32.mxu0 %v2404_v43 }
 0x37d   :  { %1598 = vmatprep.subr.bf16.mxu0 %v2013_v31 }
 0x380   :  { %1600 = vmatpush3.bf16.msra.mxu0 %v2037_v44 }
 0x381   :  { %1602 = vmatprep.subr.bf16.mxu0 %v2039_v45 }
 0x384   :  { %1604 = vmatpush3.bf16.msra.mxu0 %v2062_v55 }
 0x385   :  { %1606 = vmatprep.subr.bf16.mxu0 %v2064_v56 }
 0x388   :  { %1608 = vmatpush3.bf16.msra.mxu0 %v2087_v3 }
 0x389   :  { %1610 = vmatprep.subr.bf16.mxu0 %v2089_v5 }
 0x38c   :  { %1612 = vmatpush3.bf16.msra.mxu0 %v2112_v18 }
 0x38d   :  { %1614 = vmatprep.subr.bf16.mxu0 %v2114_v21 }
 0x390   :  { %1616 = vmatpush3.bf16.msra.mxu0 %v2140_v36 }
 0x391   :  { %1618 = vmatprep.subr.bf16.mxu0 %v2142_v37 }
 0x394   :  { %1620 = vmatpush3.bf16.msra.mxu0 %v2162_v47 }
 0x395   :  { %1622 = vmatprep.subr.bf16.mxu0 %v2164_v48 }
 0x398   :  { %1624 = vmatpush3.bf16.msra.mxu0 %v2192_v62 }
 0x39b   :  { %990 = vmatmul.mubr.f32.vlgmr.msra.gmra.mrb[8].mxu0 %v2406_v51 }
 0x39c   :  { %1700 = shalt.err (!%p1697_p4)
}
 0x39d   :  { %s1701_s13 = scalar_lea.hbm %s2546_s3, 128 }
 0x39e   :  { %p1702_p5 = scmp.ne.s32.totalorder %s2546_s3, %s1701_s13  ;;  %p1705_p6 = scmp.lt.u32.totalorder %s1701_s13, %s2546_s3 }
 0x3a0   :  { %p1707_p7 = pnand %p1705_p6, %p1702_p5 }
 0x3a2   :  { %1710 = shalt.err (!%p1707_p7)
}
 0x3a3   :  { %1075 = dma.vmem_to_hbm [thread:$0]  %s1073_s9, 128, %s2546_s3, [#allocation4]  }
 0x3a4   :  { %s1743_s20 = smov [#allocation5]  }
 0x3a5   :  { %s1082_s21 = sshll.u32 %s1743_s20, 4  ;;  %s1083_s21 = int_to_ptr.vmem [resolvable:$true] %s1082_s21 }
 0x3a6   :  { %s1711_s22 = scalar_lea.vmem %s1083_s21, 32  ;;  %p1716_p9 = scmp.lt.s32.totalorder %s1083_s21, %s1083_s21 }
 0x3a7   :  { %p1712_p8 = scmp.ne.s32.totalorder %s1083_s21, %s1711_s22  ;;  %p1717_p10 = scmp.lt.s32.totalorder %s1711_s22, %s1711_s22 }
 0x3a9   :  { %p1718_p11 = por %p1717_p10, %p1716_p9 }
 0x3ab   :  { %p1719_p12 = pnand %p1718_p11, %p1712_p8 }
 0x410   :  { %v1324_v2 = vpop.f32.mrb[4].mxu0  ;;  %v1061_v4 = vpop.f32.mrb[4].mxu1 }
 0x411   :  { %v1325_v20 = vpop.f32.mrb[5].mxu0  ;;  %v1063_v30 = vpop.f32.mrb[5].mxu1 }
 0x412   :  { %v1326_v31 = vadd.f32 %v1325_v20, %v1324_v2 }
 0x44e   :  { %v830_v44 = vpop.f32.mrb[6].mxu0 }
 0x44f   :  { %v831_v45 = vadd.f32 %v1326_v31, %v830_v44  ;;  %v832_v55 = vpop.f32.mrb[7].mxu0 }
 0x451   :  { %834 = vst [vmem:[#allocation5] sm:$0x1] %v831_v45 }
 0x46e   :  { %v1359_v56 = vpop.f32.mrb[8].mxu0 }
 0x46f   :  { %v1360_v3 = vpop.f32.mrb[9].mxu0 }
 0x470   :  { %v1361_v5 = vadd.f32 %v1360_v3, %v1359_v56 }
 0x472   :  { %v1062_v18 = vadd.f32 %v1361_v5, %v1061_v4 }
 0x474   :  { %1065 = vst [vmem:[#allocation5 + $0x1] sm:$0x1] %v1062_v18 }
 0x475   :  { %1722 = shalt.err (!%p1719_p12)
}
 0x476   :  { %s1723_s24 = scalar_lea.hbm %s2547_s4, 32 }
 0x477   :  { %p1724_p13 = scmp.ne.s32.totalorder %s2547_s4, %s1723_s24  ;;  %p1727_p0 = scmp.lt.u32.totalorder %s1723_s24, %s2547_s4 }
 0x479   :  { %p1729_p1 = pnand %p1727_p0, %p1724_p13 }
 0x47b   :  { %1732 = shalt.err (!%p1729_p1)
}
 0x47c   :  { %1085 = dma.vmem_to_hbm [thread:$0]  %s1083_s21, 32, %s2547_s4, [#allocation6]  }
 0x47d   :  { %1733 = dma.done.wait [#allocation4], 128  }
 0x47e   :  { %1734 = vsyncadd [#allocation4], 4294967168 }
 0x47f   :  { %1735 = dma.done.wait [#allocation6], 32  }
 0x480   :  { %1736 = vsyncadd [#allocation6], 4294967264 }
 0x481   :  { %1092 = vsyncpa [#allocation4], 1 }
 0x482   :  { %1093 = vsyncpa [#allocation6], 1 }

</bundles_post_ra>
